<compile_context>
chip_gen: v7x
topology: tpu7x:2x2x1
jax: 0.10.0
libtpu: 0.0.40
codegen_flags: <defaults>
</compile_context>

<pallas_src>
import functools

import jax
import jax.numpy as jnp
from jax import lax
from jax.experimental import pallas as pl
from jax.experimental.pallas import tpu as pltpu


def _round_up(x, m):
    return ((x + m - 1) // m) * m


def _round_down(x, m):
    return (x // m) * m


def channel_attention_kernel(x_ref, w1t_ref, alpha_ref, w2t_ref, o_ref, acc_ref,
                             *, L, TL, use_mxu_reduce):
    """One grid step: accumulate partial L-sums; finalize FC1->PReLU->FC2->sigmoid.

    x_ref:     (TB, C, TL) tile of x (native dtype, streamed)
    w1t_ref:   (C, H)  fc1.weight[:, :, 0].T   (f32, resident across grid)
    alpha_ref: (1, H)  PReLU per-channel slopes
    w2t_ref:   (H, C)  fc2.weight[:, :, 0].T
    o_ref:     (TB, C) output block (written only at the last L step)
    acc_ref:   (TB, C) f32 VMEM scratch accumulator
    """
    l = pl.program_id(1)
    nl = pl.num_programs(1)

    @pl.when(l == 0)
    def _init():
        acc_ref[...] = jnp.zeros_like(acc_ref)

    def reduce_tile(x):
        # Sum over the trailing (length) axis -> (TB, C) f32 partial sums.
        if use_mxu_reduce:
            # bf16/int8 stream: do the reduction on the otherwise-idle MXU with a
            # ones column (exact products), keeping upcast/adds off the VPU slots.
            tb, c, tl = x.shape
            ones = jnp.ones((tl, 1), dtype=x.dtype)
            s = jnp.dot(x.reshape(tb * c, tl), ones,
                        preferred_element_type=jnp.float32)
            return s.reshape(tb, c)
        # f32 stream: native VPU sum, f32-exact.
        return jnp.sum(x.astype(jnp.float32), axis=-1)

    has_tail = (L % TL) != 0          # static branch

    if has_tail:
        # Mask only the last (partial) L tile; all other tiles take the cheap path.
        @pl.when(l < nl - 1)
        def _accumulate_full():
            acc_ref[...] += reduce_tile(x_ref[...])

        @pl.when(l == nl - 1)
        def _accumulate_tail():
            x = x_ref[...]
            col = l * TL + lax.broadcasted_iota(jnp.int32, (1, 1, TL), 2)
            x = jnp.where(col < L, x, jnp.zeros_like(x))
            acc_ref[...] += reduce_tile(x)
    else:
        acc_ref[...] += reduce_tile(x_ref[...])

    @pl.when(l == nl - 1)
    def _finalize():
        avg = acc_ref[...] * (1.0 / L)                                  # (TB, C)
        y1 = jnp.dot(avg, w1t_ref[...],
                     preferred_element_type=jnp.float32)                # (TB, H)
        alpha = alpha_ref[...]                                          # (1, H)
        y1 = jnp.where(y1 >= 0, y1, alpha * y1)                         # PReLU
        y2 = jnp.dot(y1, w2t_ref[...],
                     preferred_element_type=jnp.float32)                # (TB, C)
        o_ref[...] = jax.nn.sigmoid(y2).astype(o_ref.dtype)


def _vmem_limit_bytes():
    """Per-generation VMEM limit: ~75% of physical, capped at 96 MiB.

    -> ~48 MiB on v7x (64 MiB physical), ~96 MiB on v5e/v6e (128 MiB physical).
    """
    cap = 64 * 1024 * 1024  # conservative fallback = v7x physical
    try:
        info = pltpu.get_tpu_info()
        cap = int(getattr(info, "vmem_capacity_bytes", cap))
    except Exception:
        pass
    return int(min(96 * 1024 * 1024, (cap * 3) // 4))


def _choose_tiles(B, C, L, H, x_itemsize, out_itemsize, vmem_limit):
    """Pick (TB, TL) so the double-buffered x block + accumulators fit vmem_limit.

    Preference order: (1) fully contiguous full-L blocks with the largest TB that
    fits; (2) if L must be tiled, the smallest TB (longest contiguous burst per
    (b, c) row) with the largest lane-dense TL that fits.
    """
    sub = max(8, 32 // max(1, out_itemsize))        # out/acc sublane granule

    weight_bytes = 2 * (2 * C * H + H) * 4          # resident (double-buffered)
    slack = 1 << 20                                 # headroom for sems/internal

    def fixed_bytes(tb):
        return tb * C * 4 + 2 * tb * C * out_itemsize + weight_bytes + slack

    def x_block_bytes(tb, tl):
        return tb * C * tl * x_itemsize

    def tb_candidates():
        if B < 16:
            return [B]                               # full-B block; too small to split
        # Cap at ceil(B/2) so there are >= 2 B tiles (v7x dual-TC 'parallel' axis).
        hi = min(_round_down(min(B, 128), sub), _round_up(pl.cdiv(B, 2), sub))
        hi = max(hi, sub)
        if hi >= B:
            return [B]
        cands = []
        tb = hi
        while True:
            cands.append(tb)
            if tb <= sub:
                break
            tb = max(sub, _round_down(tb // 2, sub))
        return cands

    cands = tb_candidates()

    # 1) Full-L (fully contiguous HBM read per block): largest TB that fits.
    for tb in cands:
        if 2 * x_block_bytes(tb, L) + fixed_bytes(tb) <= vmem_limit:
            return tb, L

    # 2) Tile L: smallest TB, biggest lane-dense TL within the budget.
    tb = cands[-1]
    budget = max(0, vmem_limit - fixed_bytes(tb)) // 2       # per x buffer
    max_tl = budget // max(1, tb * C * x_itemsize)
    tl = max(128, _round_down(max_tl, 128))
    tl = min(tl, L)
    return tb, tl


def channel_attention(x, w1, alpha, w2, *, tl=None):
    """x: (B, C, L); w1: (H, C); alpha: (H,); w2: (C, H). Returns (B, C, 1)."""
    B, C, L = x.shape
    H = w1.shape[0]
    out_dtype = x.dtype

    vmem_limit = _vmem_limit_bytes()
    TB, TL = _choose_tiles(B, C, L, H, x.dtype.itemsize, out_dtype.itemsize,
                           vmem_limit)
    if tl is not None:                 # test hook: force the tiled/masked path
        TL = min(tl, L)

    nb = pl.cdiv(B, TB)
    nl = pl.cdiv(L, TL)

    # MXU reduction only for sub-32-bit streams, and only when collapsing (TB, C)
    # into the sublane dim is layout-free (C multiple of the sublane granule).
    x_sub = max(8, 32 // max(1, x.dtype.itemsize))
    use_mxu_reduce = (x.dtype.itemsize < 4) and (C % x_sub == 0)

    # Tiny weights: transpose + f32 in glue (negligible vs streaming x).
    w1t = jnp.transpose(w1).astype(jnp.float32)         # (C, H)
    w2t = jnp.transpose(w2).astype(jnp.float32)         # (H, C)
    alpha2d = alpha.reshape(1, H).astype(jnp.float32)   # (1, H)

    kernel = functools.partial(channel_attention_kernel, L=L, TL=TL,
                               use_mxu_reduce=use_mxu_reduce)

    # Deeper input pipelining when blocks are small and the grid is long.
    x_index_map = lambda b, l: (b, 0, l)
    x_block_bytes = TB * C * TL * x.dtype.itemsize
    x_spec = pl.BlockSpec((TB, C, TL), x_index_map)
    if x_block_bytes < (2 << 20) and nb * nl >= 4:
        try:
            x_spec = pl.BlockSpec((TB, C, TL), x_index_map,
                                  pipeline_mode=pl.Buffered(3))
        except TypeError:
            x_spec = pl.BlockSpec((TB, C, TL), x_index_map)

    cost = pl.CostEstimate(
        flops=2 * B * C * L + 4 * B * C * H,
        transcendentals=B * C,
        bytes_accessed=(B * C * L * x.dtype.itemsize
                        + B * C * out_dtype.itemsize
                        + (2 * C * H + H) * 4),
    )

    out2d = pl.pallas_call(
        kernel,
        out_shape=jax.ShapeDtypeStruct((B, C), out_dtype),
        grid_spec=pltpu.PrefetchScalarGridSpec(
            num_scalar_prefetch=0,
            grid=(nb, nl),
            in_specs=[
                x_spec,                                          # x streamed
                pl.BlockSpec((C, H), lambda b, l: (0, 0)),       # resident
                pl.BlockSpec((1, H), lambda b, l: (0, 0)),       # resident
                pl.BlockSpec((H, C), lambda b, l: (0, 0)),       # resident
            ],
            out_specs=pl.BlockSpec((TB, C), lambda b, l: (b, 0)),
            scratch_shapes=[pltpu.VMEM((TB, C), jnp.float32)],
        ),
        compiler_params=pltpu.CompilerParams(
            dimension_semantics=("parallel", "arbitrary"),
            vmem_limit_bytes=vmem_limit,
        ),
        cost_estimate=cost,
    )(x, w1t, alpha2d, w2t)

    return out2d.reshape(B, C, 1)      # match PyTorch (B, C, 1) output


def channel_attention_ref(x, w1, alpha, w2):
    """Pure-JAX reference mirroring the PyTorch forward (computed in f32)."""
    xf = x.astype(jnp.float32)
    avg = jnp.mean(xf, axis=-1, keepdims=True)                # (B, C, 1)
    y1 = jnp.einsum('hc,bcl->bhl', w1.astype(jnp.float32), avg)
    y1 = jnp.where(y1 >= 0, y1, alpha.astype(jnp.float32)[None, :, None] * y1)
    y2 = jnp.einsum('ch,bhl->bcl', w2.astype(jnp.float32), y1)
    return jax.nn.sigmoid(y2)


if __name__ == "__main__":
    # Small shapes consistent with the module: in_planes=64, ratio=16 -> H=4.
    B, C, L = 2, 64, 16
    ratio = 16
    H = C // ratio

    key = jax.random.PRNGKey(0)
    kx, k1, k2 = jax.random.split(key, 3)

    x = jax.random.normal(kx, (B, C, L), dtype=jnp.float32)
    w1 = jax.random.normal(k1, (H, C), dtype=jnp.float32) * 0.1   # fc1.weight[:, :, 0]
    w2 = jax.random.normal(k2, (C, H), dtype=jnp.float32) * 0.1   # fc2.weight[:, :, 0]
    alpha = jnp.full((H,), 0.25, dtype=jnp.float32)               # PReLU default init

    # 1) Small shape, single fully-contiguous (B, C, L) block.
    out = channel_attention(x, w1, alpha, w2)
    jax.block_until_ready(out)
    ref = channel_attention_ref(x, w1, alpha, w2)
    assert out.shape == (B, C, 1), out.shape
    assert jnp.allclose(out, ref, atol=1e-5, rtol=1e-5), "mismatch vs reference (f32)"

    # 2) Tiled L: masked partial last tile + deep (3x) input buffering path.
    L2 = 520
    x2 = jax.random.normal(jax.random.PRNGKey(1), (B, C, L2), dtype=jnp.float32)
    out2 = channel_attention(x2, w1, alpha, w2, tl=128)
    jax.block_until_ready(out2)
    ref2 = channel_attention_ref(x2, w1, alpha, w2)
    assert jnp.allclose(out2, ref2, atol=1e-5, rtol=1e-5), "mismatch (tiled L + mask)"

    # 3) bf16 streaming through the MXU ones-vector reduction (f32 accumulate).
    xb = x2.astype(jnp.bfloat16)
    out3 = channel_attention(xb, w1, alpha, w2, tl=128)
    jax.block_until_ready(out3)
    ref3 = channel_attention_ref(xb, w1, alpha, w2)
    assert jnp.allclose(out3.astype(jnp.float32), ref3, atol=1e-2), "mismatch (bf16)"

    # 4) Multiple B tiles (TB < B, >=2 tiles for megacore) with a partial last B block.
    B4, L4 = 20, 256
    x4 = jax.random.normal(jax.random.PRNGKey(2), (B4, C, L4), dtype=jnp.float32)
    out4 = channel_attention(x4, w1, alpha, w2)
    jax.block_until_ready(out4)
    ref4 = channel_attention_ref(x4, w1, alpha, w2)
    assert jnp.allclose(out4, ref4, atol=1e-5, rtol=1e-5), "mismatch (B tiles)"

    print("KERNEL_OK")
</pallas_src>

<mosaic_0001>
module attributes {stable_mosaic.version = 11 : i64} {
  func.func @channel_attention_kernel(%arg0: i32, %arg1: i32, %arg2: memref<2x64x16xf32, #tpu.memory_space<vmem>>, %arg3: memref<64x4xf32, #tpu.memory_space<vmem>>, %arg4: memref<1x4xf32, #tpu.memory_space<vmem>>, %arg5: memref<4x64xf32, #tpu.memory_space<vmem>>, %arg6: memref<2x64xf32, #tpu.memory_space<vmem>>, %arg7: memref<2x64xf32, #tpu.memory_space<vmem>>) attributes {dimension_semantics = [#tpu.dimension_semantics<parallel>, #tpu.dimension_semantics<arbitrary>], iteration_bounds = array<i64: 1, 1>, scalar_prefetch = 0 : i64, scratch_operands = 1 : i64, tpu.core_type = #tpu.core_type<tc>, window_params = [{transform_indices = @transform_0, window_bounds = array<i64: 2, 64, 16>}, {pipeline_mode = #tpu.pipeline_mode<synchronous>, transform_indices = @transform_1, window_bounds = array<i64: 64, 4>}, {pipeline_mode = #tpu.pipeline_mode<synchronous>, transform_indices = @transform_2, window_bounds = array<i64: 1, 4>}, {pipeline_mode = #tpu.pipeline_mode<synchronous>, transform_indices = @transform_3, window_bounds = array<i64: 4, 64>}, {transform_indices = @transform_4, window_bounds = array<i64: 2, 64>}]} {
    %c0_i32 = arith.constant 0 : i32
    %0 = arith.cmpi eq, %arg1, %c0_i32 : i32
    %1 = arith.extui %0 : i1 to i32
    %c0_i32_0 = arith.constant 0 : i32
    %2 = arith.cmpi ne, %1, %c0_i32_0 : i32
    scf.if %2 {
      %cst_9 = arith.constant 0.000000e+00 : f32
      %11 = vector.broadcast %cst_9 : f32 to vector<2x64xf32>
      %c0_10 = arith.constant 0 : index
      %c0_11 = arith.constant 0 : index
      %12 = vector.load %arg7[%c0_10, %c0_11] : memref<2x64xf32, #tpu.memory_space<vmem>>, vector<2x64xf32>
      tpu.vector_store %arg7[%c0_10, %c0_11], %11 {strides = array<i32>} : memref<2x64xf32, #tpu.memory_space<vmem>>, vector<2x64xf32>,
    } else {
    }
    %c0 = arith.constant 0 : index
    %c0_1 = arith.constant 0 : index
    %3 = vector.load %arg7[%c0, %c0_1] : memref<2x64xf32, #tpu.memory_space<vmem>>, vector<2x64xf32>
    %c0_2 = arith.constant 0 : index
    %c0_3 = arith.constant 0 : index
    %c0_4 = arith.constant 0 : index
    %4 = vector.load %arg2[%c0_2, %c0_3, %c0_4] : memref<2x64x16xf32, #tpu.memory_space<vmem>>, vector<2x64x16xf32>
    %cst = arith.constant dense<0.000000e+00> : vector<2x64xf32>
    %5 = vector.multi_reduction <add>, %4, %cst [2] : vector<2x64x16xf32> to vector<2x64xf32>
    %6 = arith.addf %3, %5 : vector<2x64xf32>
    %c0_5 = arith.constant 0 : index
    %c0_6 = arith.constant 0 : index
    %7 = vector.load %arg7[%c0_5, %c0_6] : memref<2x64xf32, #tpu.memory_space<vmem>>, vector<2x64xf32>
    tpu.vector_store %arg7[%c0_5, %c0_6], %6 {strides = array<i32>} : memref<2x64xf32, #tpu.memory_space<vmem>>, vector<2x64xf32>,
    %c0_i32_7 = arith.constant 0 : i32
    %8 = arith.cmpi eq, %arg1, %c0_i32_7 : i32
    %9 = arith.extui %8 : i1 to i32
    %c0_i32_8 = arith.constant 0 : i32
    %10 = arith.cmpi ne, %9, %c0_i32_8 : i32
    scf.if %10 {
      %c0_9 = arith.constant 0 : index
      %c0_10 = arith.constant 0 : index
      %11 = vector.load %arg7[%c0_9, %c0_10] : memref<2x64xf32, #tpu.memory_space<vmem>>, vector<2x64xf32>
      %cst_11 = arith.constant 6.250000e-02 : f32
      %12 = vector.broadcast %cst_11 : f32 to vector<2x64xf32>
      %13 = arith.mulf %11, %12 : vector<2x64xf32>
      %c0_12 = arith.constant 0 : index
      %c0_13 = arith.constant 0 : index
      %14 = vector.load %arg3[%c0_12, %c0_13] : memref<64x4xf32, #tpu.memory_space<vmem>>, vector<64x4xf32>
      %cst_14 = arith.constant dense<0.000000e+00> : vector<2x4xf32>
      %15 = tpu.matmul %13, %14, %cst_14 {dimension_numbers = #tpu.dot_dimension_numbers<[1], [0], [0], [1], [0, 0, 1, 1], [], []>} : vector<2x64xf32>, vector<64x4xf32>, vector<2x4xf32> -> vector<2x4xf32>
      %c0_15 = arith.constant 0 : index
      %c0_16 = arith.constant 0 : index
      %16 = vector.load %arg4[%c0_15, %c0_16] : memref<1x4xf32, #tpu.memory_space<vmem>>, vector<1x4xf32>
      %cst_17 = arith.constant 0.000000e+00 : f32
      %17 = vector.broadcast %cst_17 : f32 to vector<2x4xf32>
      %18 = arith.cmpf oge, %15, %17 : vector<2x4xf32>
      %19 = vector.broadcast %16 : vector<1x4xf32> to vector<2x4xf32>
      %20 = arith.mulf %19, %15 : vector<2x4xf32>
      %21 = arith.select %18, %15, %20 : vector<2x4xi1>, vector<2x4xf32>
      %c0_18 = arith.constant 0 : index
      %c0_19 = arith.constant 0 : index
      %22 = vector.load %arg5[%c0_18, %c0_19] : memref<4x64xf32, #tpu.memory_space<vmem>>, vector<4x64xf32>
      %cst_20 = arith.constant dense<0.000000e+00> : vector<2x64xf32>
      %23 = tpu.matmul %21, %22, %cst_20 {dimension_numbers = #tpu.dot_dimension_numbers<[1], [0], [0], [1], [0, 0, 1, 1], [], []>} : vector<2x4xf32>, vector<4x64xf32>, vector<2x64xf32> -> vector<2x64xf32>
      %24 = arith.negf %23 : vector<2x64xf32>
      %25 = math.exp %24 : vector<2x64xf32>
      %cst_21 = arith.constant 1.000000e+00 : f32
      %26 = vector.broadcast %cst_21 : f32 to vector<2x64xf32>
      %27 = arith.addf %26, %25 : vector<2x64xf32>
      %28 = arith.divf %26, %27 : vector<2x64xf32>
      %c0_22 = arith.constant 0 : index
      %c0_23 = arith.constant 0 : index
      %29 = vector.load %arg6[%c0_22, %c0_23] : memref<2x64xf32, #tpu.memory_space<vmem>>, vector<2x64xf32>
      tpu.vector_store %arg6[%c0_22, %c0_23], %28 {strides = array<i32>} : memref<2x64xf32, #tpu.memory_space<vmem>>, vector<2x64xf32>,
    } else {
    }
    return
  }
  func.func @transform_0(%arg0: i32, %arg1: i32) -> (i32, i32, i32) {
    %c0_i32 = arith.constant 0 : i32
    %c0_i32_0 = arith.constant 0 : i32
    return %arg0, %c0_i32, %arg1 : i32, i32, i32
  }
  func.func @transform_1(%arg0: i32, %arg1: i32) -> (i32, i32) {
    %c0_i32 = arith.constant 0 : i32
    %c0_i32_0 = arith.constant 0 : i32
    %c0_i32_1 = arith.constant 0 : i32
    return %c0_i32, %c0_i32_0 : i32, i32
  }
  func.func @transform_2(%arg0: i32, %arg1: i32) -> (i32, i32) {
    %c0_i32 = arith.constant 0 : i32
    %c0_i32_0 = arith.constant 0 : i32
    %c0_i32_1 = arith.constant 0 : i32
    return %c0_i32, %c0_i32_0 : i32, i32
  }
  func.func @transform_3(%arg0: i32, %arg1: i32) -> (i32, i32) {
    %c0_i32 = arith.constant 0 : i32
    %c0_i32_0 = arith.constant 0 : i32
    %c0_i32_1 = arith.constant 0 : i32
    return %c0_i32, %c0_i32_0 : i32, i32
  }
  func.func @transform_4(%arg0: i32, %arg1: i32) -> (i32, i32) {
    %c0_i32 = arith.constant 0 : i32
    %c0_i32_0 = arith.constant 0 : i32
    return %arg0, %c0_i32 : i32, i32
  }
}

</mosaic_0001>

<bundles_post_ra>
// kernel: tpu_custom_call.1
= control target key start
LH: loop header
LB: loop body
LE: loop exit
PB: predicated region body
PF: predicated region fallthrough
CT: control target
= control target key end

     0   :  { %vm41_vm0 = vcmask 130048   ;;  %s635_s0 = inlined_call_operand.vmem [shape: f32[2,64,16], index: 0, kind: input, shape index: {}]   ;;  %s636_s1 = inlined_call_operand.vmem [shape: f32[64,4], index: 1, kind: input, shape index: {}]   ;;  %s637_s2 = inlined_call_operand.vmem [shape: f32[1,4], index: 2, kind: input, shape index: {}]   ;;  %s638_s3 = inlined_call_operand.vmem [shape: f32[4,64], index: 3, kind: input, shape index: {}]   ;;  %s639_s4 = inlined_call_operand.hbm [shape: f32[2,64], index: 4, kind: output, shape index: {}]  }
   0x1   :  { %v33_v0 = vld [vmem:[%s635_s0 + $0x40] sm:$0xff]  ;;  %v34_v2 = vld [vmem:[%s635_s0 + $0x48] sm:$0xff]  ;;  %v35_v8 = vld [vmem:[%s635_s0 + $0x50] sm:$0xff] }
   0x2   :  { %v25_v1 = vld [vmem:[%s635_s0] sm:$0xff]  ;;  %v66_v3 = vsel %vm41_vm0, %v33_v0, 0.0  ;;  %v26_v5 = vld [vmem:[%s635_s0 + $0x8] sm:$0xff]  ;;  %v69_v6 = vsel %vm41_vm0, %v34_v2, 0.0  ;;  %v27_v9 = vld [vmem:[%s635_s0 + $0x10] sm:$0xff] }
   0x3   :  { %v42_v4 = vsel %vm41_vm0, %v25_v1, 0.0  ;;  %67 = vadd.xlane.f32.xlu1 %v66_v3  ;;  %v45_v7 = vsel %vm41_vm0, %v26_v5, 0.0 }
   0x4   :  { %43 = vadd.xlane.f32.xlu0 %v42_v4 }
   0x7   :  { %70 = vadd.xlane.f32.xlu1 %v69_v6 }
   0x8   :  { %46 = vadd.xlane.f32.xlu0 %v45_v7 }
   0x9   :  { %9 = vsyncpa [#allocation4], 0  ;;  %v72_v10 = vsel %vm41_vm0, %v35_v8, 0.0  ;;  %v48_v11 = vsel %vm41_vm0, %v27_v9, 0.0  ;;  %v36_v12 = vld [vmem:[%s635_s0 + $0x58] sm:$0xff]  ;;  %v37_v16 = vld [vmem:[%s635_s0 + $0x60] sm:$0xff]  ;;  %v106_v50 = vlaneseq }
   0xa   :  { %v28_v13 = vld [vmem:[%s635_s0 + $0x18] sm:$0xff]  ;;  %v75_v14 = vsel %vm41_vm0, %v36_v12, 0.0  ;;  %v29_v17 = vld [vmem:[%s635_s0 + $0x20] sm:$0xff]  ;;  %v78_v18 = vsel %vm41_vm0, %v37_v16, 0.0  ;;  %v38_v20 = vld [vmem:[%s635_s0 + $0x68] sm:$0xff]  ;;  %vm22_vm1 = vcmask 517120  }
   0xb   :  { %73 = vadd.xlane.f32.xlu1 %v72_v10  ;;  %v51_v15 = vsel %vm41_vm0, %v28_v13, 0.0  ;;  %v54_v19 = vsel %vm41_vm0, %v29_v17, 0.0  ;;  %v30_v21 = vld [vmem:[%s635_s0 + $0x28] sm:$0xff]  ;;  %v81_v22 = vsel %vm41_vm0, %v38_v20, 0.0  ;;  %v39_v24 = vld [vmem:[%s635_s0 + $0x70] sm:$0xff]  ;;  %v40_v28 = vld [vmem:[%s635_s0 + $0x78] sm:$0xff] }
   0xc   :  { %49 = vadd.xlane.f32.xlu0 %v48_v11  ;;  %v57_v23 = vsel %vm41_vm0, %v30_v21, 0.0  ;;  %v31_v25 = vld [vmem:[%s635_s0 + $0x30] sm:$0xff]  ;;  %v84_v26 = vsel %vm41_vm0, %v39_v24, 0.0  ;;  %v32_v29 = vld [vmem:[%s635_s0 + $0x38] sm:$0xff]  ;;  %v87_v30 = vsel %vm41_vm0, %v40_v28, 0.0  ;;  %v487_v32 = vmov 0.0  }
   0xd   :  { %v60_v27 = vsel %vm41_vm0, %v31_v25, 0.0  ;;  %v63_v31 = vsel %vm41_vm0, %v32_v29, 0.0  ;;  %23 = vst.msk [vmem:[#allocation2] sm:$0x3] %vm22_vm1, %v487_v32  ;;  %438 = vmatprep.subr.mxu1 %v487_v32  ;;  %v211_v33 = vld [vmem:[%s636_s1] sm:$0xff]  ;;  %v212_v34 = vld [vmem:[%s636_s1 + $0x8] sm:$0xff] }
   0xe   :  { %v444_v35 = vpack.c.bf16 %v212_v34, %v211_v33  ;;  %v488_v36 = vmov 0.0|0.0   ;;  %v213_v37 = vld [vmem:[%s636_s1 + $0x10] sm:$0xff]  ;;  %v214_v38 = vld [vmem:[%s636_s1 + $0x18] sm:$0xff]  ;;  %v215_v40 = vld [vmem:[%s636_s1 + $0x20] sm:$0xff]  ;;  %vm489_vm2 = vmmov 0   ;;  %v107_v53 = vand.u32 127, %v106_v50 }
   0xf   :  { %76 = vadd.xlane.f32.xlu1 %v75_v14  ;;  %443 = vmatprep.subr.bf16.mxu0 %v488_v36  ;;  %v447_v39 = vpack.c.bf16 %v214_v38, %v213_v37  ;;  %v216_v41 = vld [vmem:[%s636_s1 + $0x28] sm:$0xff]  ;;  %v217_v43 = vld [vmem:[%s636_s1 + $0x30] sm:$0xff]  ;;  %v218_v44 = vld [vmem:[%s636_s1 + $0x38] sm:$0xff]  ;;  %v109_v58 = vshrl.u32 %v106_v50, 7  ;;  %vm117_vm3 = vcmask 130112   ;;  %vm124_vm4 = vcmask 195712  }
  0x10   :  { %52 = vadd.xlane.f32.xlu0 %v51_v15  ;;  %445 = vmatpush3.bf16.msra.mxu0 %v444_v35  ;;  %v450_v42 = vpack.c.bf16 %v216_v41, %v215_v40  ;;  %v453_v45 = vpack.c.bf16 %v218_v44, %v217_v43  ;;  %v112_v56 = vadd.s32 4294967288, %v107_v53  ;;  %v119_v57 = vadd.s32 4294967280, %v107_v53 }
  0x11   :  { %446 = vmatprep.subr.bf16.mxu0 %v488_v36  ;;  %435 = vmatprep.mubr.msk.f32.mxu0 %vm489_vm2, %v487_v32  ;;  %v126_v59 = vadd.s32 4294967272, %v107_v53  ;;  %v133_v60 = vadd.s32 4294967264, %v107_v53  ;;  %v140_v0 = vadd.s32 4294967256, %v107_v53  ;;  %v147_v2 = vadd.s32 4294967248, %v107_v53 }
  0x12   :  { %440 = vmatprep.mubr.msk.f32.mxu1 %vm489_vm2, %v487_v32  ;;  %v115_v63 = vsub.s32 %v112_v56, %v109_v58  ;;  %v122_v1 = vsub.s32 %v119_v57, %v109_v58  ;;  %v110_v3 = vsub.s32 %v107_v53, %v109_v58  ;;  %v154_v8 = vadd.s32 4294967240, %v107_v53 }
  0x13   :  { %79 = vadd.xlane.f32.xlu1 %v78_v18  ;;  %v129_v4 = vsub.s32 %v126_v59, %v109_v58  ;;  %v136_v5 = vsub.s32 %v133_v60, %v109_v58  ;;  %vm131_vm5 = vcmask 261312   ;;  %v143_v11 = vsub.s32 %v140_v0, %v109_v58 }
  0x14   :  { %55 = vadd.xlane.f32.xlu0 %v54_v19  ;;  %448 = vmatpush3.bf16.msra.mxu0 %v447_v39  ;;  %vm138_vm6 = vcmask 326912   ;;  %v150_v14 = vsub.s32 %v147_v2, %v109_v58  ;;  %vm145_vm7 = vcmask 392512   ;;  %vm152_vm8 = vcmask 458112   ;;  %v24_v44 = vld [vmem:[#allocation2] sm:$0x3] }
  0x15   :  { %449 = vmatprep.subr.bf16.mxu0 %v488_v36  ;;  %vm159_vm9 = vcmask 523712   ;;  %vm200_vm10 = vcmask 1041409   ;;  %vm219_vm11 = vcmask 523264   ;;  %vm308_vm12 = vcmask 1043456  }
  0x16   :  { %vm304_vm14 = vcmask 31744  }
  0x17   :  { %82 = vadd.xlane.f32.xlu1 %v81_v22 }
  0x18   :  { %58 = vadd.xlane.f32.xlu0 %v57_v23  ;;  %451 = vmatpush3.bf16.msra.mxu0 %v450_v42  ;;  %v157_v23 = vsub.s32 %v154_v8, %v109_v58 }
  0x19   :  { %452 = vmatprep.subr.bf16.mxu0 %v488_v36 }
  0x1b   :  { %85 = vadd.xlane.f32.xlu1 %v84_v26 }
  0x1c   :  { %61 = vadd.xlane.f32.xlu0 %v60_v27  ;;  %454 = vmatpush3.bf16.msra.mxu0 %v453_v45 }
  0x1f   :  { %88 = vadd.xlane.f32.xlu1 %v87_v30 }
  0x20   :  { %64 = vadd.xlane.f32.xlu0 %v63_v31 }
  0x90   :  { %v68_v46 = vpop.xlane.xlu1 %67 }
  0x91   :  { %v44_v47 = vpop.xlane.xlu0 %43  ;;  %v164_v15 = vrot.slane %v68_v46, %v110_v3 }
  0x92   :  { %v111_v16 = vrot.slane %v44_v47, %v110_v3 }
  0x94   :  { %v71_v48 = vpop.xlane.xlu1 %70 }
  0x95   :  { %v47_v49 = vpop.xlane.xlu0 %46  ;;  %v168_v9 = vrot.slane %v71_v48, %v115_v63 }
  0x96   :  { %v116_v10 = vrot.slane %v47_v49, %v115_v63 }
  0x97   :  { %v169_v24 = vsel %vm117_vm3, %v168_v9, %v164_v15 }
  0x98   :  { %v74_v51 = vpop.xlane.xlu1 %73  ;;  %v118_v25 = vsel %vm117_vm3, %v116_v10, %v111_v16 }
  0x99   :  { %v50_v52 = vpop.xlane.xlu0 %49  ;;  %v173_v12 = vrot.slane %v74_v51, %v122_v1  ;;  %v303_v51 = vld [vmem:[%s638_s3] sm:$0xf]  ;;  %s490_s3 = smov [#allocation3]  }
  0x9a   :  { %v123_v13 = vrot.slane %v50_v52, %v122_v1  ;;  %439 = vmatpush3.msk.msra.mxu1 %vm308_vm12, %v303_v51  ;;  %v404_v52 = vld [vmem:[%s637_s2] ss:$0 sm:$0xff]  ;;  %s395_s13 = sshll.u32 %s490_s3, 4  ;;  %s396_s13 = int_to_ptr.vmem [resolvable:$true] %s395_s13 }
  0x9b   :  { %v174_v28 = vsel %vm124_vm4, %v173_v12, %v169_v24  ;;  %s463_s2 = scalar_lea.vmem %s396_s13, 32  ;;  %p468_p1 = scmp.lt.s32.totalorder %s396_s13, %s396_s13 }
  0x9c   :  { %v77_v54 = vpop.xlane.xlu1 %76  ;;  %v125_v29 = vsel %vm124_vm4, %v123_v13, %v118_v25  ;;  %p464_p0 = scmp.ne.s32.totalorder %s396_s13, %s463_s2  ;;  %p469_p2 = scmp.lt.s32.totalorder %s463_s2, %s463_s2 }
  0x9d   :  { %v53_v55 = vpop.xlane.xlu0 %52  ;;  %v178_v17 = vrot.slane %v77_v54, %v129_v4 }
  0x9e   :  { %v130_v18 = vrot.slane %v53_v55, %v129_v4  ;;  %p470_p3 = por %p469_p2, %p468_p1 }
  0x9f   :  { %v179_v32 = vsel %vm131_vm5, %v178_v17, %v174_v28 }
  0xa0   :  { %v80_v61 = vpop.xlane.xlu1 %79  ;;  %v132_v33 = vsel %vm131_vm5, %v130_v18, %v125_v29  ;;  %p471_p4 = pnand %p470_p3, %p464_p0 }
  0xa1   :  { %v56_v62 = vpop.xlane.xlu0 %55  ;;  %v183_v19 = vrot.slane %v80_v61, %v136_v5 }
  0xa2   :  { %v137_v20 = vrot.slane %v56_v62, %v136_v5 }
  0xa3   :  { %v184_v34 = vsel %vm138_vm6, %v183_v19, %v179_v32 }
  0xa4   :  { %v83_v6 = vpop.xlane.xlu1 %82  ;;  %v139_v35 = vsel %vm138_vm6, %v137_v20, %v132_v33 }
  0xa5   :  { %v59_v7 = vpop.xlane.xlu0 %58  ;;  %v188_v26 = vrot.slane %v83_v6, %v143_v11 }
  0xa6   :  { %v144_v27 = vrot.slane %v59_v7, %v143_v11 }
  0xa7   :  { %v189_v38 = vsel %vm145_vm7, %v188_v26, %v184_v34 }
  0xa8   :  { %v86_v21 = vpop.xlane.xlu1 %85  ;;  %v146_v39 = vsel %vm145_vm7, %v144_v27, %v139_v35 }
  0xa9   :  { %v62_v22 = vpop.xlane.xlu0 %61  ;;  %v193_v30 = vrot.slane %v86_v21, %v150_v14 }
  0xaa   :  { %v151_v31 = vrot.slane %v62_v22, %v150_v14 }
  0xab   :  { %v194_v42 = vsel %vm152_vm8, %v193_v30, %v189_v38 }
  0xac   :  { %v89_v36 = vpop.xlane.xlu1 %88  ;;  %v153_v43 = vsel %vm152_vm8, %v151_v31, %v146_v39 }
  0xad   :  { %v65_v37 = vpop.xlane.xlu0 %64  ;;  %v198_v40 = vrot.slane %v89_v36, %v157_v23 }
  0xae   :  { %v158_v41 = vrot.slane %v65_v37, %v157_v23 }
  0xaf   :  { %v199_v45 = vsel %vm159_vm9, %v198_v40, %v194_v42 }
  0xb0   :  { %v160_v46 = vsel %vm159_vm9, %v158_v41, %v153_v43 }
  0xb1   :  { %v201_v47 = vsel %vm200_vm10, %v199_v45, %v160_v46 }
  0xb2   :  { %v203_v48 = vadd.f32 %v201_v47, %v24_v44 }
  0xb4   :  { %205 = vst.msk [vmem:[#allocation2] sm:$0x3] %vm22_vm1, %v203_v48 }
  0xbb   :  { %v209_v49 = vld [vmem:[#allocation2] sm:$0x3] }
  0xbc   :  { %v210_v50 = vmul.f32 0.0625, %v209_v49 }
  0xbe   :  { %436 = vmatmul.mubr.msk.f32.vlgmr.msra.gmra.mrb[0].mxu0 %vm219_vm11, %v210_v50 }
 0x191   :  { %v289_v53 = vpop.f32.mrb[0].mxu0 }
 0x192   :  { %vm294_vm13 = vcmp.ge.f32.partialorder %v289_v53, 0.0  ;;  %v301_v54 = vmul.f32 %v404_v52, %v289_v53  ;;  %v437_v55 = vpop.f32.mrb[1].mxu0 }
 0x194   :  { %v302_v56 = vsel %vm294_vm13, %v289_v53, %v301_v54 }
 0x195   :  { %441 = vmatmul.mubr.msk.f32.vlgmr.msra.gmra.mrb[0].mxu1 %vm304_vm14, %v302_v56 }
 0x268   :  { %v378_v57 = vpop.f32.mrb[0].mxu1 }
 0x269   :  { %v407_v58 = vmul.f32 -1.442695, %v378_v57  ;;  %v442_v59 = vpop.f32.mrb[1].mxu1 }
 0x26b   :  { %459 = vpow2.f32 %v407_v58 }
 0x275   :  { %v460_v60 = vpop.eup %459 }
 0x276   :  { %v385_v61 = vadd.f32 1.0, %v460_v60 }
 0x278   :  { %461 = vrcp.f32 %v385_v61 }
 0x282   :  { %v462_v62 = vpop.eup %461 }
 0x283   :  { %388 = vst.msk [vmem:[#allocation3] sm:$0x3] %vm22_vm1, %v462_v62 }
 0x284   :  { %474 = shalt.err (!%p471_p4)
}
 0x285   :  { %s475_s16 = scalar_lea.hbm %s639_s4, 32 }
 0x286   :  { %p476_p5 = scmp.ne.s32.totalorder %s639_s4, %s475_s16  ;;  %p479_p6 = scmp.lt.u32.totalorder %s475_s16, %s639_s4 }
 0x288   :  { %p481_p7 = pnand %p479_p6, %p476_p5 }
 0x28a   :  { %484 = shalt.err (!%p481_p7)
}
 0x28b   :  { %398 = dma.vmem_to_hbm [thread:$0]  %s396_s13, 32, %s639_s4, [#allocation4]  }
 0x28c   :  { %485 = dma.done.wait [#allocation4], 32  }
 0x28d   :  { %486 = vsyncadd [#allocation4], 4294967264 }
 0x28e   :  { %402 = vsyncpa [#allocation4], 1 }

</bundles_post_ra>
